<compile_context>
chip_gen: v6e
topology: v6e:2x2x1
jax: 0.10.0
libtpu: 0.0.40
codegen_flags: <defaults>
</compile_context>

<pallas_src>
import functools
import math

import jax
import jax.numpy as jnp
from jax import lax
from jax.experimental import pallas as pl
from jax.experimental.pallas import tpu as pltpu


# ------------------------------ small helpers --------------------------------

def _round_up(x, m):
    return ((x + m - 1) // m) * m


def _pad_to(a, shape):
    pads = [(0, s - d) for d, s in zip(a.shape, shape)]
    return jnp.pad(a, pads)


# ----------------------------- Pallas kernels --------------------------------

def _proj_kernel(x_ref, w_ref, b_ref, o_ref, *, mm_dtype):
    """One tile of the input projection: o = x @ W_i_packed + bias_packed.

    x_ref: (TM, D)   w_ref: (D, 3H)   b_ref: (1, 3H)   o_ref: (TM, 3H)
    """
    x = x_ref[...].astype(mm_dtype)
    w = w_ref[...].astype(mm_dtype)
    o_ref[...] = (jnp.dot(x, w, preferred_element_type=jnp.float32)
                  + b_ref[...])


def _gru_seq_kernel(gx_ref, wh_ref, bhn_ref, out_ref, h_scr, *, mm_dtype):
    """Recurrence over one (T_chunk, B_block) tile; emits all hidden states.

    gx_ref:  (TC, Bb, 3H)  precomputed x-side gates (biases folded, order r|z|n)
    wh_ref:  (H, 3H)       packed hidden weights
    bhn_ref: (1, H)        b_hn (kept separate because of the r* gating)
    out_ref: (TC, Bb, H)
    h_scr:   (Bb, H)       hidden carry, persists across the T grid axis
    """
    @pl.when(pl.program_id(1) == 0)
    def _():
        h_scr[...] = jnp.zeros_like(h_scr)

    TC, Bb, _ = gx_ref.shape
    H = out_ref.shape[-1]
    wh = wh_ref[...].astype(mm_dtype)
    bhn = jnp.broadcast_to(bhn_ref[...], (Bb, H))       # hoisted broadcast

    def step(t, h):
        gx = gx_ref[t]                                  # (Bb, 3H)
        gh = jnp.dot(h.astype(mm_dtype), wh,
                     preferred_element_type=jnp.float32)
        rz = jax.nn.sigmoid(gx[:, :2 * H] + gh[:, :2 * H])
        r = rz[:, :H]
        z = rz[:, H:]
        n = jnp.tanh(gx[:, 2 * H:] + r * (gh[:, 2 * H:] + bhn))
        h_new = (1.0 - z) * n + z * h
        out_ref[t] = h_new
        return h_new

    h_scr[...] = lax.fori_loop(0, TC, step, h_scr[...], unroll=2)


def _gru_last_kernel(gx_ref, wh_ref, bhn_ref, len_ref, out_ref,
                     h_scr, last_scr, *, mm_dtype, use_abs):
    """Last GRU layer: recurrence + fused last-step gather + l2norm epilogue.

    len_ref:  (Bb, 1) int32 valid lengths
    out_ref:  (Bb, H) l2-normalized hidden at t = length-1 (written at the end)
    """
    t_blk = pl.program_id(1)

    @pl.when(t_blk == 0)
    def _():
        h_scr[...] = jnp.zeros_like(h_scr)
        last_scr[...] = jnp.zeros_like(last_scr)

    TC, Bb, _ = gx_ref.shape
    H = out_ref.shape[-1]
    wh = wh_ref[...].astype(mm_dtype)
    bhn = jnp.broadcast_to(bhn_ref[...], (Bb, H))
    t_last = len_ref[...] - 1                           # (Bb, 1) int32
    t0 = t_blk * TC

    def step(t, carry):
        h, last = carry
        gx = gx_ref[t]
        gh = jnp.dot(h.astype(mm_dtype), wh,
                     preferred_element_type=jnp.float32)
        rz = jax.nn.sigmoid(gx[:, :2 * H] + gh[:, :2 * H])
        r = rz[:, :H]
        z = rz[:, H:]
        n = jnp.tanh(gx[:, 2 * H:] + r * (gh[:, 2 * H:] + bhn))
        h_new = (1.0 - z) * n + z * h
        last = jnp.where(t_last == t0 + t, h_new, last)
        return h_new, last

    h, last = lax.fori_loop(0, TC, step, (h_scr[...], last_scr[...]), unroll=2)
    h_scr[...] = h
    last_scr[...] = last

    @pl.when(t_blk == pl.num_programs(1) - 1)
    def _():
        x = last_scr[...]
        # l2norm over dim=1 (padded H columns are exactly zero -> exact).
        nrm = jnp.sqrt(jnp.sum(x * x, axis=1, keepdims=True))
        y = x / nrm
        if use_abs:
            y = jnp.abs(y)
        out_ref[...] = y


# ----------------------------- kernel wrappers --------------------------------

def input_projection(x2d, w, b, *, tm=256, mm_dtype=jnp.float32):
    """gx = x2d @ w + b  as a tiled, pipelined Pallas matmul.

    x2d: (M, D)  w: (D, 3H)  b: (1, 3H)  -> (M, 3H) f32
    """
    M, D = x2d.shape
    N = w.shape[1]
    tm = min(tm, _round_up(M, 8))
    M_pad = _round_up(M, tm)
    if M_pad != M:
        x2d = jnp.pad(x2d, ((0, M_pad - M), (0, 0)))

    out = pl.pallas_call(
        functools.partial(_proj_kernel, mm_dtype=mm_dtype),
        out_shape=jax.ShapeDtypeStruct((M_pad, N), jnp.float32),
        grid=(M_pad // tm,),
        in_specs=[pl.BlockSpec((tm, D), lambda i: (i, 0)),
                  pl.BlockSpec((D, N), lambda i: (0, 0)),
                  pl.BlockSpec((1, N), lambda i: (0, 0))],
        out_specs=pl.BlockSpec((tm, N), lambda i: (i, 0)),
        compiler_params=pltpu.CompilerParams(
            dimension_semantics=("parallel",)),
    )(x2d, w, b)
    return out[:M] if M_pad != M else out


def gru_layer(gx_tbg, wh, bhn, *, t_chunk, b_block, lengths=None,
              use_abs=False, mm_dtype=jnp.float32):
    """Run one GRU layer's recurrence.

    gx_tbg: (T_pad, B_pad, 3H) precomputed input-side gates.
    If `lengths` is None: returns all hidden states (T_pad, B_pad, H).
    Else (last layer): returns l2-normalized hidden at t = length-1, (B_pad, H).
    """
    T_pad, B_pad, G = gx_tbg.shape
    H = wh.shape[0]
    grid = (B_pad // b_block, T_pad // t_chunk)          # (batch, time)

    gx_spec = pl.BlockSpec((t_chunk, b_block, G), lambda b, t: (t, b, 0))
    wh_spec = pl.BlockSpec(wh.shape, lambda b, t: (0, 0))     # weights resident
    bhn_spec = pl.BlockSpec(bhn.shape, lambda b, t: (0, 0))
    cparams = pltpu.CompilerParams(
        dimension_semantics=("parallel", "arbitrary"))

    if lengths is None:
        return pl.pallas_call(
            functools.partial(_gru_seq_kernel, mm_dtype=mm_dtype),
            out_shape=jax.ShapeDtypeStruct((T_pad, B_pad, H), jnp.float32),
            grid=grid,
            in_specs=[gx_spec, wh_spec, bhn_spec],
            out_specs=pl.BlockSpec((t_chunk, b_block, H), lambda b, t: (t, b, 0)),
            scratch_shapes=[pltpu.VMEM((b_block, H), jnp.float32)],
            compiler_params=cparams,
        )(gx_tbg, wh, bhn)

    len_spec = pl.BlockSpec((b_block, 1), lambda b, t: (b, 0))
    return pl.pallas_call(
        functools.partial(_gru_last_kernel, mm_dtype=mm_dtype, use_abs=use_abs),
        out_shape=jax.ShapeDtypeStruct((B_pad, H), jnp.float32),
        grid=grid,
        in_specs=[gx_spec, wh_spec, bhn_spec, len_spec],
        out_specs=pl.BlockSpec((b_block, H), lambda b, t: (b, 0)),
        scratch_shapes=[pltpu.VMEM((b_block, H), jnp.float32),
                        pltpu.VMEM((b_block, H), jnp.float32)],
        compiler_params=cparams,
    )(gx_tbg, wh, bhn, lengths)


# --------------------------- parameter handling --------------------------------

def init_encoder_text_params(key, vocab_size, word_dim, embed_size, num_layers):
    """Raw torch-layout parameters (same shapes / init as the nn.Module)."""
    keys = jax.random.split(key, 1 + 4 * num_layers)
    params = {}
    params["embed"] = jax.random.uniform(
        keys[0], (vocab_size, word_dim), jnp.float32, -0.1, 0.1)
    k = 1.0 / math.sqrt(embed_size)
    layers = []
    for l in range(num_layers):
        d_in = word_dim if l == 0 else embed_size
        kw = keys[1 + 4 * l: 1 + 4 * (l + 1)]
        layers.append({
            "w_ih": jax.random.uniform(kw[0], (3 * embed_size, d_in), jnp.float32, -k, k),
            "w_hh": jax.random.uniform(kw[1], (3 * embed_size, embed_size), jnp.float32, -k, k),
            "b_ih": jax.random.uniform(kw[2], (3 * embed_size,), jnp.float32, -k, k),
            "b_hh": jax.random.uniform(kw[3], (3 * embed_size,), jnp.float32, -k, k),
        })
    params["gru"] = layers
    return params


def prepare_encoder_text_params(raw):
    """One-time transform: pack per-gate weights, fold biases, pad to TPU-friendly
    shapes (H, D -> multiples of 128 lanes).  Zero-padding is mathematically exact
    (padded hidden units stay identically 0)."""
    word_dim = raw["embed"].shape[1]
    H = raw["gru"][0]["w_hh"].shape[1]
    Hp = _round_up(H, 128)
    Dp = _round_up(word_dim, 128)

    embed = _pad_to(raw["embed"].astype(jnp.float32),
                    (raw["embed"].shape[0], Dp))

    layers = []
    for l, lp in enumerate(raw["gru"]):
        d_in_p = Dp if l == 0 else Hp
        w_ih = lp["w_ih"].astype(jnp.float32)            # (3H, d_in)
        w_hh = lp["w_hh"].astype(jnp.float32)            # (3H, H)
        b_ih = lp["b_ih"].astype(jnp.float32)
        b_hh = lp["b_hh"].astype(jnp.float32)

        wi = jnp.concatenate(
            [_pad_to(w_ih[g * H:(g + 1) * H, :].T, (d_in_p, Hp)) for g in range(3)],
            axis=1)                                      # (d_in_p, 3Hp)
        wh = jnp.concatenate(
            [_pad_to(w_hh[g * H:(g + 1) * H, :].T, (Hp, Hp)) for g in range(3)],
            axis=1)                                      # (Hp, 3Hp)
        bi = jnp.concatenate([
            _pad_to(b_ih[0 * H:1 * H] + b_hh[0 * H:1 * H], (Hp,)),   # r
            _pad_to(b_ih[1 * H:2 * H] + b_hh[1 * H:2 * H], (Hp,)),   # z
            _pad_to(b_ih[2 * H:3 * H], (Hp,)),                       # n (input side)
        ])[None, :]                                      # (1, 3Hp)
        bhn = _pad_to(b_hh[2 * H:3 * H], (Hp,))[None, :]  # (1, Hp)

        layers.append({"wi": wi, "wh": wh, "bi": bi, "bhn": bhn})

    return {"embed": embed, "layers": layers, "H": H, "Hp": Hp, "Dp": Dp}


# --------------------------- EncoderText forward --------------------------------

def encoder_text_forward(prepared, x_tokens, lengths, use_abs=False,
                         matmul_dtype=jnp.float32):
    """x_tokens: (B, T) int32 ids; lengths: (B,) int32 valid lengths (>=1).
    Returns (B, embed_size) f32 L2-normalized caption embeddings.
    Set matmul_dtype=jnp.bfloat16 on v6e/v7x for MXU-native matmuls."""
    B, T = x_tokens.shape
    H, Hp = prepared["H"], prepared["Hp"]

    # Embedding lookup (gather) -- plain-JAX glue.
    emb = jnp.take(prepared["embed"], x_tokens, axis=0)      # (B, T, Dp)

    # Padded, time-major layout for the recurrence kernels.
    B_pad = _round_up(B, 8)
    per_t_bytes = B_pad * 4 * Hp * 4                         # gx(3Hp)+out(Hp) f32
    t_chunk = max(1, min(T, min(128, (4 << 20) // max(per_t_bytes, 1))))
    T_pad = _round_up(T, t_chunk)
    b_block = B_pad // 2 if (B_pad % 16 == 0) else B_pad     # 2 blocks -> megacore

    x = jnp.transpose(emb, (1, 0, 2))                        # (T, B, Dp)
    x = jnp.pad(x, ((0, T_pad - T), (0, B_pad - B), (0, 0)))
    lens = jnp.pad(lengths.astype(jnp.int32), (0, B_pad - B),
                   constant_values=1).reshape(B_pad, 1)

    h = x
    out = None
    n_layers = len(prepared["layers"])
    for l, layer in enumerate(prepared["layers"]):
        d_in = h.shape[-1]
        gx = input_projection(h.reshape(T_pad * B_pad, d_in),
                              layer["wi"], layer["bi"], mm_dtype=matmul_dtype)
        gx = gx.reshape(T_pad, B_pad, 3 * Hp)
        if l < n_layers - 1:
            h = gru_layer(gx, layer["wh"], layer["bhn"],
                          t_chunk=t_chunk, b_block=b_block,
                          mm_dtype=matmul_dtype)             # (T_pad, B_pad, Hp)
        else:
            out = gru_layer(gx, layer["wh"], layer["bhn"],
                            t_chunk=t_chunk, b_block=b_block,
                            lengths=lens, use_abs=use_abs,
                            mm_dtype=matmul_dtype)           # (B_pad, Hp)

    return out[:B, :H]


# ------------------------------ pure-JAX reference ------------------------------

def _reference_forward(raw, x_tokens, lengths, embed_size, use_abs=False):
    emb = raw["embed"][x_tokens]                             # (B, T, D)
    B = emb.shape[0]
    H = embed_size
    h_seq = jnp.transpose(emb, (1, 0, 2)).astype(jnp.float32)
    for lp in raw["gru"]:
        w_ih, w_hh, b_ih, b_hh = lp["w_ih"], lp["w_hh"], lp["b_ih"], lp["b_hh"]

        def cell(h, x_t):
            gi = x_t @ w_ih.T + b_ih
            gh = h @ w_hh.T + b_hh
            r = jax.nn.sigmoid(gi[:, :H] + gh[:, :H])
            z = jax.nn.sigmoid(gi[:, H:2 * H] + gh[:, H:2 * H])
            n = jnp.tanh(gi[:, 2 * H:] + r * gh[:, 2 * H:])
            h_new = (1.0 - z) * n + z * h
            return h_new, h_new

        _, h_seq = lax.scan(cell, jnp.zeros((B, H), jnp.float32), h_seq)
    last = h_seq[lengths - 1, jnp.arange(B), :]
    nrm = jnp.sqrt(jnp.sum(last * last, axis=1, keepdims=True))
    out = last / nrm
    return jnp.abs(out) if use_abs else out


# --------------------------------- main -----------------------------------------

if __name__ == "__main__":
    vocab_size, word_dim, embed_size, num_layers = 50, 32, 32, 2
    B, T = 2, 8

    key = jax.random.PRNGKey(0)
    k_param, k_tok = jax.random.split(key)

    raw = init_encoder_text_params(k_param, vocab_size, word_dim,
                                   embed_size, num_layers)
    prepared = prepare_encoder_text_params(raw)

    x_tokens = jax.random.randint(k_tok, (B, T), 0, vocab_size, dtype=jnp.int32)
    lengths = jnp.array([8, 6], dtype=jnp.int32)   # sorted descending, as pack requires

    out = encoder_text_forward(prepared, x_tokens, lengths, use_abs=False)
    out = jax.block_until_ready(out)

    assert out.shape == (B, embed_size)
    assert bool(jnp.all(jnp.isfinite(out)))

    ref = _reference_forward(raw, x_tokens, lengths, embed_size, use_abs=False)
    assert bool(jnp.allclose(out, ref, rtol=2e-3, atol=2e-3)), "mismatch vs reference"

    print("KERNEL_OK")
</pallas_src>

<mosaic_0001>
module attributes {stable_mosaic.version = 11 : i64} {
  func.func @_proj_kernel(%arg0: i32, %arg1: memref<64x128xf32, #tpu.memory_space<vmem>>, %arg2: memref<128x384xf32, #tpu.memory_space<vmem>>, %arg3: memref<1x384xf32, #tpu.memory_space<vmem>>, %arg4: memref<64x384xf32, #tpu.memory_space<vmem>>) attributes {dimension_semantics = [#tpu.dimension_semantics<parallel>], iteration_bounds = array<i64: 1>, scalar_prefetch = 0 : i64, scratch_operands = 0 : i64, tpu.core_type = #tpu.core_type<tc>, window_params = [{transform_indices = @transform_0, window_bounds = array<i64: 64, 128>}, {pipeline_mode = #tpu.pipeline_mode<synchronous>, transform_indices = @transform_1, window_bounds = array<i64: 128, 384>}, {pipeline_mode = #tpu.pipeline_mode<synchronous>, transform_indices = @transform_2, window_bounds = array<i64: 1, 384>}, {transform_indices = @transform_3, window_bounds = array<i64: 64, 384>}]} {
    %c0 = arith.constant 0 : index
    %c0_0 = arith.constant 0 : index
    %0 = vector.load %arg1[%c0, %c0_0] : memref<64x128xf32, #tpu.memory_space<vmem>>, vector<64x128xf32>
    %c0_1 = arith.constant 0 : index
    %c0_2 = arith.constant 0 : index
    %1 = vector.load %arg2[%c0_1, %c0_2] : memref<128x384xf32, #tpu.memory_space<vmem>>, vector<128x384xf32>
    %cst = arith.constant dense<0.000000e+00> : vector<64x384xf32>
    %2 = tpu.matmul %0, %1, %cst {dimension_numbers = #tpu.dot_dimension_numbers<[1], [0], [0], [1], [0, 0, 1, 1], [], []>} : vector<64x128xf32>, vector<128x384xf32>, vector<64x384xf32> -> vector<64x384xf32>
    %c0_3 = arith.constant 0 : index
    %c0_4 = arith.constant 0 : index
    %3 = vector.load %arg3[%c0_3, %c0_4] : memref<1x384xf32, #tpu.memory_space<vmem>>, vector<1x384xf32>
    %4 = vector.broadcast %3 : vector<1x384xf32> to vector<64x384xf32>
    %5 = arith.addf %2, %4 : vector<64x384xf32>
    %c0_5 = arith.constant 0 : index
    %c0_6 = arith.constant 0 : index
    %6 = vector.load %arg4[%c0_5, %c0_6] : memref<64x384xf32, #tpu.memory_space<vmem>>, vector<64x384xf32>
    tpu.vector_store %arg4[%c0_5, %c0_6], %5 {strides = array<i32>} : memref<64x384xf32, #tpu.memory_space<vmem>>, vector<64x384xf32>,
    return
  }
  func.func @transform_0(%arg0: i32) -> (i32, i32) {
    %c0_i32 = arith.constant 0 : i32
    %c0_i32_0 = arith.constant 0 : i32
    return %arg0, %c0_i32 : i32, i32
  }
  func.func @transform_1(%arg0: i32) -> (i32, i32) {
    %c0_i32 = arith.constant 0 : i32
    %c0_i32_0 = arith.constant 0 : i32
    %c0_i32_1 = arith.constant 0 : i32
    return %c0_i32, %c0_i32_0 : i32, i32
  }
  func.func @transform_2(%arg0: i32) -> (i32, i32) {
    %c0_i32 = arith.constant 0 : i32
    %c0_i32_0 = arith.constant 0 : i32
    %c0_i32_1 = arith.constant 0 : i32
    return %c0_i32, %c0_i32_0 : i32, i32
  }
  func.func @transform_3(%arg0: i32) -> (i32, i32) {
    %c0_i32 = arith.constant 0 : i32
    %c0_i32_0 = arith.constant 0 : i32
    return %arg0, %c0_i32 : i32, i32
  }
}

</mosaic_0001>

<bundles_post_ra>
// kernel: tpu_custom_call.1
= control target key start
LH: loop header
LB: loop body
LE: loop exit
PB: predicated region body
PF: predicated region fallthrough
CT: control target
= control target key end

     0   :  { %8 = vsyncpa [#allocation3], 0  ;;  %s592_s0 = inlined_call_operand.hbm [shape: f32[64,128], index: 0, kind: input, shape index: {}]   ;;  %s593_s1 = inlined_call_operand.hbm [shape: f32[128,384], index: 1, kind: input, shape index: {}]   ;;  %s594_s2 = inlined_call_operand.vmem [shape: f32[1,384], index: 2, kind: input, shape index: {}]   ;;  %s595_s3 = inlined_call_operand.hbm [shape: f32[64,384], index: 3, kind: output, shape index: {}]  }
   0x1   :  { %9 = vsyncpa [#allocation6], 0 }
   0x2   :  { %10 = vsyncpa [#allocation4], 0  ;;  %s518_s12 = smov [#allocation2]  }
   0x3   :  { %s16_s13 = sshll.u32 %s518_s12, 4  ;;  %s17_s13 = int_to_ptr.vmem [resolvable:$true] %s16_s13 }
   0x4   :  { %s460_s14 = scalar_lea.vmem %s17_s13, 1024  ;;  %p465_p1 = scmp.lt.s32.totalorder %s17_s13, %s17_s13 }
   0x5   :  { %p461_p0 = scmp.ne.s32.totalorder %s17_s13, %s460_s14  ;;  %p466_p2 = scmp.lt.s32.totalorder %s460_s14, %s460_s14 }
   0x7   :  { %p467_p3 = por %p466_p2, %p465_p1 }
   0x9   :  { %p468_p4 = pnand %p467_p3, %p461_p0 }
   0xb   :  { %471 = shalt.err (!%p468_p4)
}
   0xc   :  { %s519_s15 = smov 128   ;;  %s520_s16 = smov 8  }
   0xd   :  { %22 = dma.hbm_to_vmem [thread:$0]  %s592_s0, 1024, %s17_s13, [#allocation3], %s519_s15, %s519_s15, %s520_s16  }
   0xe   :  { %s521_s19 = smov [#allocation5]  }
   0xf   :  { %s28_s20 = sshll.u32 %s521_s19, 4  ;;  %s29_s20 = int_to_ptr.vmem [resolvable:$true] %s28_s20 }
  0x10   :  { %s480_s21 = scalar_lea.vmem %s29_s20, 6144  ;;  %p485_p6 = scmp.lt.s32.totalorder %s29_s20, %s29_s20 }
  0x11   :  { %p481_p5 = scmp.ne.s32.totalorder %s29_s20, %s480_s21  ;;  %p486_p7 = scmp.lt.s32.totalorder %s480_s21, %s480_s21 }
  0x13   :  { %p487_p8 = por %p486_p7, %p485_p6 }
  0x15   :  { %p488_p9 = pnand %p487_p8, %p481_p5 }
  0x17   :  { %491 = shalt.err (!%p488_p9)
}
  0x18   :  { %s522_s22 = smov 384   ;;  %s523_s23 = smov 24  }
  0x19   :  { %34 = dma.hbm_to_vmem [thread:$0]  %s593_s1, 6144, %s29_s20, [#allocation6], %s522_s22, %s522_s22, %s523_s23  }
  0x1a   :  { %512 = dma.done.wait [#allocation3], 1024  }
  0x1b   :  { %513 = vsyncadd [#allocation3], 4294966272 }
  0x1c   :  { %514 = dma.done.wait [#allocation6], 6144  }
  0x1d   :  { %515 = vsyncadd [#allocation6], 4294961152  ;;  %v524_v0 = vmov 0.0   ;;  %v97_v1 = vld [vmem:[#allocation5 + $0x170] sm:$0xff]  ;;  %v96_v2 = vld [vmem:[#allocation5 + $0x168] sm:$0xff]  ;;  %v101_v57 = vlaneseq }
  0x1e   :  { %180 = vmatprep.mubr.f32.mxu0 %v524_v0  ;;  %v94_v3 = vld [vmem:[#allocation5 + $0x158] sm:$0xff]  ;;  %116 = vmatprep.subr.mxu0 %v97_v1  ;;  %v93_v4 = vld [vmem:[#allocation5 + $0x150] sm:$0xff]  ;;  %v91_v5 = vld [vmem:[#allocation5 + $0x140] sm:$0xff] }
  0x1f   :  { %117 = vmatpush1.msra.mxu0 %v96_v2  ;;  %v90_v6 = vld [vmem:[#allocation5 + $0x138] sm:$0xff]  ;;  %v88_v7 = vld [vmem:[#allocation5 + $0x128] sm:$0xff]  ;;  %v87_v8 = vld [vmem:[#allocation5 + $0x120] sm:$0xff]  ;;  %v102_v58 = vshrl.u32 %v101_v57, 7 }
  0x20   :  { %118 = vmatprep.subr.mxu0 %v94_v3  ;;  %v98_v9 = vld [vmem:[#allocation5 + $0x178] sm:$0xff]  ;;  %v85_v10 = vld [vmem:[#allocation5 + $0x110] sm:$0xff]  ;;  %v95_v11 = vld [vmem:[#allocation5 + $0x160] sm:$0xff] }
  0x21   :  { %119 = vmatpush1.msra.mxu0 %v93_v4  ;;  %400 = vmatprep.subr.mxu1 %v98_v9  ;;  %v84_v12 = vld [vmem:[#allocation5 + $0x108] sm:$0xff]  ;;  %v82_v14 = vld [vmem:[#allocation5 + $0xf8] sm:$0xff]  ;;  %v81_v15 = vld [vmem:[#allocation5 + $0xf0] sm:$0xff]  ;;  %v103_v59 = vsub.s32 0, %v102_v58  ;;  %v107_v61 = vsub.s32 1, %v102_v58  ;;  %v111_v63 = vsub.s32 2, %v102_v58 }
  0x22   :  { %120 = vmatprep.subr.mxu0 %v91_v5  ;;  %401 = vmatpush3.msra.mxu1 %v98_v9  ;;  %v92_v13 = vld [vmem:[#allocation5 + $0x148] sm:$0xff]  ;;  %v89_v16 = vld [vmem:[#allocation5 + $0x130] sm:$0xff]  ;;  %v79_v17 = vld [vmem:[#allocation5 + $0xe0] sm:$0xff] }
  0x23   :  { %121 = vmatpush1.msra.mxu0 %v90_v6  ;;  %402 = vmatprep.subr.mxu1 %v95_v11  ;;  %v78_v18 = vld [vmem:[#allocation5 + $0xd8] sm:$0xff]  ;;  %v76_v20 = vld [vmem:[#allocation5 + $0xc8] sm:$0xff]  ;;  %v75_v21 = vld [vmem:[#allocation5 + $0xc0] sm:$0xff] }
  0x24   :  { %122 = vmatprep.subr.mxu0 %v88_v7  ;;  %403 = vmatpush3.msra.mxu1 %v95_v11  ;;  %v86_v19 = vld [vmem:[#allocation5 + $0x118] sm:$0xff]  ;;  %v83_v22 = vld [vmem:[#allocation5 + $0x100] sm:$0xff]  ;;  %v73_v23 = vld [vmem:[#allocation5 + $0xb0] sm:$0xff] }
  0x25   :  { %123 = vmatpush1.msra.mxu0 %v87_v8  ;;  %404 = vmatprep.subr.mxu1 %v92_v13  ;;  %v72_v24 = vld [vmem:[#allocation5 + $0xa8] sm:$0xff]  ;;  %v70_v26 = vld [vmem:[#allocation5 + $0x98] sm:$0xff]  ;;  %v69_v27 = vld [vmem:[#allocation5 + $0x90] sm:$0xff] }
  0x26   :  { %124 = vmatprep.subr.mxu0 %v85_v10  ;;  %405 = vmatpush3.msra.mxu1 %v92_v13  ;;  %v80_v25 = vld [vmem:[#allocation5 + $0xe8] sm:$0xff]  ;;  %v77_v28 = vld [vmem:[#allocation5 + $0xd0] sm:$0xff]  ;;  %v67_v29 = vld [vmem:[#allocation5 + $0x80] sm:$0xff] }
  0x27   :  { %125 = vmatpush1.msra.mxu0 %v84_v12  ;;  %406 = vmatprep.subr.mxu1 %v89_v16  ;;  %v66_v30 = vld [vmem:[#allocation5 + $0x78] sm:$0xff]  ;;  %v64_v32 = vld [vmem:[#allocation5 + $0x68] sm:$0xff]  ;;  %v63_v33 = vld [vmem:[#allocation5 + $0x60] sm:$0xff] }
  0x28   :  { %126 = vmatprep.subr.mxu0 %v82_v14  ;;  %407 = vmatpush3.msra.mxu1 %v89_v16  ;;  %v74_v31 = vld [vmem:[#allocation5 + $0xb8] sm:$0xff]  ;;  %v71_v34 = vld [vmem:[#allocation5 + $0xa0] sm:$0xff]  ;;  %v61_v35 = vld [vmem:[#allocation5 + $0x50] sm:$0xff] }
  0x29   :  { %127 = vmatpush1.msra.mxu0 %v81_v15  ;;  %408 = vmatprep.subr.mxu1 %v86_v19  ;;  %v60_v36 = vld [vmem:[#allocation5 + $0x48] sm:$0xff]  ;;  %v58_v38 = vld [vmem:[#allocation5 + $0x38] sm:$0xff]  ;;  %v57_v39 = vld [vmem:[#allocation5 + $0x30] sm:$0xff] }
  0x2a   :  { %128 = vmatprep.subr.mxu0 %v79_v17  ;;  %409 = vmatpush3.msra.mxu1 %v86_v19  ;;  %v68_v37 = vld [vmem:[#allocation5 + $0x88] sm:$0xff]  ;;  %v65_v40 = vld [vmem:[#allocation5 + $0x70] sm:$0xff]  ;;  %v55_v41 = vld [vmem:[#allocation5 + $0x20] sm:$0xff] }
  0x2b   :  { %129 = vmatpush1.msra.mxu0 %v78_v18  ;;  %410 = vmatprep.subr.mxu1 %v83_v22  ;;  %v54_v42 = vld [vmem:[#allocation5 + $0x18] sm:$0xff]  ;;  %v52_v44 = vld [vmem:[#allocation5 + $0x8] sm:$0xff]  ;;  %v51_v45 = vld [vmem:[#allocation5] sm:$0xff] }
  0x2c   :  { %130 = vmatprep.subr.mxu0 %v76_v20  ;;  %411 = vmatpush3.msra.mxu1 %v83_v22  ;;  %v62_v43 = vld [vmem:[#allocation5 + $0x58] sm:$0xff]  ;;  %v59_v46 = vld [vmem:[#allocation5 + $0x40] sm:$0xff]  ;;  %v56_v48 = vld [vmem:[#allocation5 + $0x28] sm:$0xff] }
  0x2d   :  { %131 = vmatpush1.msra.mxu0 %v75_v21  ;;  %412 = vmatprep.subr.mxu1 %v80_v25  ;;  %v43_v47 = vld [vmem:[#allocation2] sm:$0xff]  ;;  %v53_v49 = vld [vmem:[#allocation5 + $0x10] sm:$0xff]  ;;  %v44_v50 = vld [vmem:[#allocation2 + $0x8] sm:$0xff] }
  0x2e   :  { %132 = vmatprep.subr.mxu0 %v73_v23  ;;  %413 = vmatpush3.msra.mxu1 %v80_v25  ;;  %v45_v51 = vld [vmem:[#allocation2 + $0x10] sm:$0xff]  ;;  %v46_v52 = vld [vmem:[#allocation2 + $0x18] sm:$0xff]  ;;  %v47_v53 = vld [vmem:[#allocation2 + $0x20] sm:$0xff] }
  0x2f   :  { %133 = vmatpush1.msra.mxu0 %v72_v24  ;;  %414 = vmatprep.subr.mxu1 %v77_v28  ;;  %v49_v54 = vld [vmem:[#allocation2 + $0x30] sm:$0xff]  ;;  %v48_v55 = vld [vmem:[#allocation2 + $0x28] sm:$0xff]  ;;  %v50_v56 = vld [vmem:[#allocation2 + $0x38] sm:$0xff] }
  0x30   :  { %134 = vmatprep.subr.mxu0 %v70_v26  ;;  %415 = vmatpush3.msra.mxu1 %v77_v28  ;;  %v99_v60 = vld [vmem:[%s594_s2] sm:$0x7]  ;;  %s525_s2 = smov [#allocation7]  }
  0x31   :  { %135 = vmatpush1.msra.mxu0 %v69_v27  ;;  %416 = vmatprep.subr.mxu1 %v74_v31  ;;  %v566_v62 = vrot.slane %v99_v60, %v103_v59  ;;  %v568_v1 = vrot.slane %v99_v60, %v107_v61  ;;  %v112_v5 = vrot.slane %v99_v60, %v111_v63  ;;  %s363_s26 = sshll.u32 %s525_s2, 4  ;;  %s364_s26 = int_to_ptr.vmem [resolvable:$true] %s363_s26 }
  0x32   :  { %136 = vmatprep.subr.mxu0 %v67_v29  ;;  %417 = vmatpush3.msra.mxu1 %v74_v31  ;;  %s492_s27 = scalar_lea.vmem %s364_s26, 3072  ;;  %p497_p11 = scmp.lt.s32.totalorder %s364_s26, %s364_s26 }
  0x33   :  { %137 = vmatpush1.msra.mxu0 %v66_v30  ;;  %418 = vmatprep.subr.mxu1 %v71_v34  ;;  %p493_p10 = scmp.ne.s32.totalorder %s364_s26, %s492_s27  ;;  %p498_p12 = scmp.lt.s32.totalorder %s492_s27, %s492_s27 }
  0x34   :  { %138 = vmatprep.subr.mxu0 %v64_v32  ;;  %419 = vmatpush3.msra.mxu1 %v71_v34 }
  0x35   :  { %139 = vmatpush1.msra.mxu0 %v63_v33  ;;  %420 = vmatprep.subr.mxu1 %v68_v37  ;;  %p499_p13 = por %p498_p12, %p497_p11 }
  0x36   :  { %140 = vmatprep.subr.mxu0 %v61_v35  ;;  %421 = vmatpush3.msra.mxu1 %v68_v37 }
  0x37   :  { %141 = vmatpush1.msra.mxu0 %v60_v36  ;;  %422 = vmatprep.subr.mxu1 %v65_v40  ;;  %p500_p0 = pnand %p499_p13, %p493_p10 }
  0x38   :  { %142 = vmatprep.subr.mxu0 %v58_v38  ;;  %423 = vmatpush3.msra.mxu1 %v65_v40 }
  0x39   :  { %143 = vmatpush1.msra.mxu0 %v57_v39  ;;  %424 = vmatprep.subr.mxu1 %v62_v43 }
  0x3a   :  { %144 = vmatprep.subr.mxu0 %v55_v41  ;;  %425 = vmatpush3.msra.mxu1 %v62_v43 }
  0x3b   :  { %145 = vmatpush1.msra.mxu0 %v54_v42  ;;  %426 = vmatprep.subr.mxu1 %v59_v46 }
  0x3c   :  { %146 = vmatprep.subr.mxu0 %v52_v44  ;;  %427 = vmatpush3.msra.mxu1 %v59_v46 }
  0x3d   :  { %147 = vmatpush1.msra.mxu0 %v51_v45  ;;  %428 = vmatprep.subr.mxu1 %v56_v48 }
  0x3e   :  { %181 = vmatmul.mubr.f32.vlgmr.msra.gmra.mxu0 %v43_v47  ;;  %429 = vmatpush3.msra.mxu1 %v56_v48 }
  0x3f   :  { %186 = vmatprep.mubr.f32.mxu0 %v524_v0  ;;  %432 = vmatprep.mubr.f32.mxu1 %v43_v47 }
  0x40   :  { %430 = vmatprep.subr.mxu1 %v53_v49 }
  0x41   :  { %431 = vmatpush3.msra.mxu1 %v53_v49 }
  0x42   :  { %187 = vmatmul.mubr.f32.gmra.mxu0 %v44_v50  ;;  %433 = vmatmul.mubr.f32.vlgmr.msra.gmra.mxu1 %v44_v50 }
  0x43   :  { %192 = vmatprep.mubr.f32.mxu0 %v524_v0  ;;  %435 = vmatprep.mubr.f32.mxu1 %v45_v51 }
  0x46   :  { %193 = vmatmul.mubr.f32.gmra.mxu0 %v45_v51  ;;  %436 = vmatmul.mubr.f32.gmra.mxu1 %v46_v52 }
  0x47   :  { %198 = vmatprep.mubr.f32.mxu0 %v524_v0  ;;  %438 = vmatprep.mubr.f32.mxu1 %v47_v53 }
  0x4a   :  { %199 = vmatmul.mubr.f32.gmra.mxu0 %v46_v52  ;;  %439 = vmatmul.mubr.f32.gmra.mxu1 %v48_v55 }
  0x4b   :  { %204 = vmatprep.mubr.f32.mxu0 %v524_v0  ;;  %441 = vmatprep.mubr.f32.mxu1 %v49_v54 }
  0x4e   :  { %205 = vmatmul.mubr.f32.gmra.mxu0 %v47_v53  ;;  %442 = vmatmul.mubr.f32.gmra.mxu1 %v50_v56 }
  0x4f   :  { %210 = vmatprep.mubr.f32.mxu0 %v524_v0 }
  0x52   :  { %211 = vmatmul.mubr.f32.gmra.mxu0 %v48_v55 }
  0x53   :  { %216 = vmatprep.mubr.f32.mxu0 %v524_v0 }
  0x56   :  { %217 = vmatmul.mubr.f32.gmra.mxu0 %v49_v54 }
  0x57   :  { %222 = vmatprep.mubr.f32.mxu0 %v524_v0 }
  0x5a   :  { %223 = vmatmul.mubr.f32.gmra.mxu0 %v50_v56 }
  0xfe   :  { %v182_v2 = vpop.f32.mrf.mxu0 }
  0xff   :  { %v183_v3 = vadd.f32 %v182_v2, %v566_v62 }
 0x100   :  { %v184_v4 = vpop.f32.mrf.mxu0 }
 0x101   :  { %334 = vst [vmem:[#allocation7] sm:$0xff] %v183_v3  ;;  %v185_v0 = vadd.f32 %v184_v4, %v568_v1 }
 0x102   :  { %v188_v6 = vpop.f32.mrf.mxu0  ;;  %v434_v8 = vpop.f32.mrf.mxu1 }
 0x103   :  { %335 = vst [vmem:[#allocation7 + $0x8] sm:$0xff] %v185_v0  ;;  %v189_v7 = vadd.f32 %v188_v6, %v566_v62  ;;  %v301_v10 = vadd.f32 %v434_v8, %v112_v5 }
 0x104   :  { %v190_v9 = vpop.f32.mrf.mxu0  ;;  %v295_v12 = vpop.f32.mrf.mxu1 }
 0x105   :  { %337 = vst [vmem:[#allocation7 + $0x18] sm:$0xff] %v189_v7  ;;  %v191_v11 = vadd.f32 %v190_v9, %v568_v1  ;;  %339 = vst [vmem:[#allocation7 + $0x28] sm:$0xff] %v301_v10  ;;  %v296_v14 = vadd.f32 %v295_v12, %v112_v5 }
 0x106   :  { %v194_v13 = vpop.f32.mrf.mxu0  ;;  %v437_v16 = vpop.f32.mrf.mxu1 }
 0x107   :  { %338 = vst [vmem:[#allocation7 + $0x20] sm:$0xff] %v191_v11  ;;  %v195_v15 = vadd.f32 %v194_v13, %v566_v62  ;;  %336 = vst [vmem:[#allocation7 + $0x10] sm:$0xff] %v296_v14  ;;  %v311_v18 = vadd.f32 %v437_v16, %v112_v5 }
 0x108   :  { %v196_v17 = vpop.f32.mrf.mxu0  ;;  %v305_v20 = vpop.f32.mrf.mxu1 }
 0x109   :  { %340 = vst [vmem:[#allocation7 + $0x30] sm:$0xff] %v195_v15  ;;  %v197_v19 = vadd.f32 %v196_v17, %v568_v1  ;;  %345 = vst [vmem:[#allocation7 + $0x58] sm:$0xff] %v311_v18  ;;  %v306_v22 = vadd.f32 %v305_v20, %v112_v5 }
 0x10a   :  { %v200_v21 = vpop.f32.mrf.mxu0  ;;  %v440_v24 = vpop.f32.mrf.mxu1 }
 0x10b   :  { %341 = vst [vmem:[#allocation7 + $0x38] sm:$0xff] %v197_v19  ;;  %v201_v23 = vadd.f32 %v200_v21, %v566_v62  ;;  %342 = vst [vmem:[#allocation7 + $0x40] sm:$0xff] %v306_v22  ;;  %v321_v26 = vadd.f32 %v440_v24, %v112_v5 }
 0x10c   :  { %v202_v25 = vpop.f32.mrf.mxu0  ;;  %v315_v28 = vpop.f32.mrf.mxu1 }
 0x10d   :  { %343 = vst [vmem:[#allocation7 + $0x48] sm:$0xff] %v201_v23  ;;  %v203_v27 = vadd.f32 %v202_v25, %v568_v1  ;;  %351 = vst [vmem:[#allocation7 + $0x88] sm:$0xff] %v321_v26  ;;  %v316_v30 = vadd.f32 %v315_v28, %v112_v5 }
 0x10e   :  { %v206_v29 = vpop.f32.mrf.mxu0  ;;  %v443_v32 = vpop.f32.mrf.mxu1 }
 0x10f   :  { %344 = vst [vmem:[#allocation7 + $0x50] sm:$0xff] %v203_v27  ;;  %v207_v31 = vadd.f32 %v206_v29, %v566_v62  ;;  %348 = vst [vmem:[#allocation7 + $0x70] sm:$0xff] %v316_v30  ;;  %v331_v34 = vadd.f32 %v443_v32, %v112_v5 }
 0x110   :  { %v208_v33 = vpop.f32.mrf.mxu0  ;;  %v325_v36 = vpop.f32.mrf.mxu1 }
 0x111   :  { %346 = vst [vmem:[#allocation7 + $0x60] sm:$0xff] %v207_v31  ;;  %v209_v35 = vadd.f32 %v208_v33, %v568_v1  ;;  %357 = vst [vmem:[#allocation7 + $0xb8] sm:$0xff] %v331_v34  ;;  %v326_v38 = vadd.f32 %v325_v36, %v112_v5 }
 0x112   :  { %v212_v37 = vpop.f32.mrf.mxu0 }
 0x113   :  { %347 = vst [vmem:[#allocation7 + $0x68] sm:$0xff] %v209_v35  ;;  %v213_v39 = vadd.f32 %v212_v37, %v566_v62  ;;  %354 = vst [vmem:[#allocation7 + $0xa0] sm:$0xff] %v326_v38 }
 0x114   :  { %v214_v40 = vpop.f32.mrf.mxu0 }
 0x115   :  { %349 = vst [vmem:[#allocation7 + $0x78] sm:$0xff] %v213_v39  ;;  %v215_v41 = vadd.f32 %v214_v40, %v568_v1 }
 0x116   :  { %v218_v42 = vpop.f32.mrf.mxu0 }
 0x117   :  { %350 = vst [vmem:[#allocation7 + $0x80] sm:$0xff] %v215_v41  ;;  %v219_v43 = vadd.f32 %v218_v42, %v566_v62 }
 0x118   :  { %v220_v44 = vpop.f32.mrf.mxu0 }
 0x119   :  { %352 = vst [vmem:[#allocation7 + $0x90] sm:$0xff] %v219_v43  ;;  %v221_v45 = vadd.f32 %v220_v44, %v568_v1 }
 0x11a   :  { %v224_v46 = vpop.f32.mrf.mxu0 }
 0x11b   :  { %353 = vst [vmem:[#allocation7 + $0x98] sm:$0xff] %v221_v45  ;;  %v225_v47 = vadd.f32 %v224_v46, %v566_v62 }
 0x11c   :  { %v226_v48 = vpop.f32.mrf.mxu0 }
 0x11d   :  { %355 = vst [vmem:[#allocation7 + $0xa8] sm:$0xff] %v225_v47  ;;  %v227_v49 = vadd.f32 %v226_v48, %v568_v1 }
 0x11f   :  { %356 = vst [vmem:[#allocation7 + $0xb0] sm:$0xff] %v227_v49 }
 0x120   :  { %503 = shalt.err (!%p500_p0)
}
 0x121   :  { %369 = dma.vmem_to_hbm [thread:$0]  %s364_s26, 3072, %s595_s3, [#allocation4], %s522_s22, %s522_s22, %s523_s23  }
 0x122   :  { %516 = dma.done.wait [#allocation4], 3072  }
 0x123   :  { %517 = vsyncadd [#allocation4], 4294964224 }
 0x124   :  { %373 = vsyncpa [#allocation3], 1 }
 0x125   :  { %374 = vsyncpa [#allocation6], 1 }
 0x126   :  { %375 = vsyncpa [#allocation4], 1 }

</bundles_post_ra>
